<compile_context>
chip_gen: v7x
topology: tpu7x:2x2x1
jax: 0.10.0
libtpu: 0.0.40
codegen_flags: <defaults>
</compile_context>

<pallas_src>
import functools
import random

import numpy as np
import jax
import jax.numpy as jnp
from jax.experimental import pallas as pl
from jax.experimental.pallas import tpu as pltpu


_NEG = -1e9  # padding value for logits (vanishes under softmax / logsumexp)


def _round_up(x, m):
    return ((x + m - 1) // m) * m


# ----------------------------- kernel helpers -------------------------------

def _xyxy_cols(b):
    # b: (N, 4) in (x, y, w, h) -> column slices (N, 1) of x1, y1, x2, y2
    x1 = b[:, 0:1]
    y1 = b[:, 1:2]
    x2 = x1 + b[:, 2:3]
    y2 = y1 + b[:, 3:4]
    return x1, y1, x2, y2


def _xyxy_rows(bt):
    # bt: (4, T) in (x, y, w, h) -> row slices (1, T)
    x1 = bt[0:1, :]
    y1 = bt[1:2, :]
    x2 = x1 + bt[2:3, :]
    y2 = y1 + bt[3:4, :]
    return x1, y1, x2, y2


def _giou(oc, tc, recip):
    # generalized IoU with a caller-supplied reciprocal (approx for the
    # matching cost, exact for the returned loss).
    ox1, oy1, ox2, oy2 = oc
    tx1, ty1, tx2, ty2 = tc
    area_o = (ox2 - ox1) * (oy2 - oy1)
    area_t = (tx2 - tx1) * (ty2 - ty1)
    inter = (jnp.maximum(jnp.minimum(ox2, tx2) - jnp.maximum(ox1, tx1), 0.0) *
             jnp.maximum(jnp.minimum(oy2, ty2) - jnp.maximum(oy1, ty1), 0.0))
    union = area_o + area_t - inter
    iou = inter * recip(union)
    area_c = (jnp.maximum(jnp.maximum(ox2, tx2) - jnp.minimum(ox1, tx1), 0.0) *
              jnp.maximum(jnp.maximum(oy2, ty2) - jnp.minimum(oy1, ty1), 0.0))
    return iou - (area_c - union) * recip(area_c)


def _sum2d(x):
    # lane-wise reduce first, then the cross-sublane reduce -> (1, 1)
    return jnp.sum(jnp.sum(x, axis=1, keepdims=True), axis=0, keepdims=True)


# ------------------------------ Pallas kernels -------------------------------

def _cost_kernel(logits_ref, onehot_ref, out_bbox_ref, tgt_bbox_t_ref,
                 cost_ref, lse_ref, *, coef_class, coef_bbox, coef_giou):
    logits = logits_ref[0].astype(jnp.float32)    # (TILE_Q, C_pad)
    onehot = onehot_ref[0]                        # (C_pad, T_pad), per-image one-hot
    ob = out_bbox_ref[0].astype(jnp.float32)      # (TILE_Q, 4)
    tbt = tgt_bbox_t_ref[0].astype(jnp.float32)   # (4, T_pad)

    # row softmax statistics; lse is emitted and reused by the loss kernel so
    # the class loss never re-reads the (N, C) logits.
    m = jnp.max(logits, axis=-1, keepdims=True)
    e = jnp.exp(logits - m)
    s = jnp.sum(e, axis=-1, keepdims=True)
    lse_ref[0] = m + jnp.log(s)

    # class cost: -softmax(logits)[:, tgt_ids]; numerator contracted against the
    # one-hot target classes on the MXU, denominator via one EUP reciprocal.
    num = jnp.dot(e, onehot, preferred_element_type=jnp.float32)   # (TILE_Q, T_pad)
    cost = (-coef_class) * (num * pl.reciprocal(s, approx=True))

    # L1 bbox cost (cdist p=1), folded into the single running accumulator.
    for k in range(4):
        cost = cost + coef_bbox * jnp.abs(ob[:, k:k + 1] - tbt[k:k + 1, :])

    # GIoU cost (approx reciprocal is fine for matching costs).
    approx_recip = lambda x: pl.reciprocal(x + 1e-8, approx=True)
    giou = _giou(_xyxy_cols(ob), _xyxy_rows(tbt), approx_recip)    # (TILE_Q, T_pad)
    # NOTE: reference uses "coef_giou + cost_giou" (additive); reproduced — a
    # constant offset does not change the Hungarian assignment.
    cost = cost + (coef_giou - giou)

    cost_ref[0] = cost


def _loss_kernel(lse_ref, picked_ref, w_ref, ob_ref, tb_ref, msk_ref, loss_ref,
                 *, coef_class, coef_bbox, coef_giou):
    lse = lse_ref[...]        # (N_pad, 1) log-sum-exp from the cost kernel
    picked = picked_ref[...]  # (N_pad, 1) logits[n, tgt_label[n]]
    w = w_ref[...]            # (N_pad, 1) empty_weight[tgt_label[n]] (0 on pad rows)

    # weighted cross entropy, reduction='mean' (PyTorch: sum(w*CE)/sum(w));
    # padded rows carry w == 0 and lse == picked == 0 -> excluded exactly.
    ce = lse - picked
    loss_class = coef_class * (_sum2d(w * ce) / _sum2d(w))

    ob = ob_ref[...].astype(jnp.float32)   # (M_pad, 4) matched pred boxes
    tb = tb_ref[...].astype(jnp.float32)   # (M_pad, 4) matched tgt boxes
    msk = msk_ref[...]                     # (M_pad, 1) 1 for real rows

    # L1 bbox loss (sum over matched, masked)
    loss_bbox = coef_bbox * _sum2d(jnp.abs(ob - tb) * msk)

    # diagonal generalized IoU loss: exact divisions in the returned loss;
    # max(denom, tiny) keeps padded all-zero rows NaN-free.
    exact_recip = lambda x: 1.0 / jnp.maximum(x, 1e-12)
    giou = _giou(_xyxy_cols(ob), _xyxy_cols(tb), exact_recip)      # (M_pad, 1)
    loss_giou = coef_giou * _sum2d((1.0 - giou) * msk)

    loss_ref[...] = loss_class + loss_bbox + loss_giou


# ------------------------------ Pallas wrappers ------------------------------

def pallas_cost_matrix(logits_pad, onehot, bboxes_pad, tgt_bbox_t, coefs, tile_q):
    b, q_pad, c_pad = logits_pad.shape
    t_pad = onehot.shape[-1]
    kernel = functools.partial(_cost_kernel, coef_class=coefs[0],
                               coef_bbox=coefs[1], coef_giou=coefs[2])
    return pl.pallas_call(
        kernel,
        out_shape=(jax.ShapeDtypeStruct((b, q_pad, t_pad), jnp.float32),
                   jax.ShapeDtypeStruct((b, q_pad, 1), jnp.float32)),
        grid=(b, q_pad // tile_q),
        in_specs=[pl.BlockSpec((1, tile_q, c_pad), lambda bi, qi: (bi, qi, 0)),
                  pl.BlockSpec((1, c_pad, t_pad), lambda bi, qi: (bi, 0, 0)),
                  pl.BlockSpec((1, tile_q, 4), lambda bi, qi: (bi, qi, 0)),
                  pl.BlockSpec((1, 4, t_pad), lambda bi, qi: (bi, 0, 0))],
        out_specs=(pl.BlockSpec((1, tile_q, t_pad), lambda bi, qi: (bi, qi, 0)),
                   pl.BlockSpec((1, tile_q, 1), lambda bi, qi: (bi, qi, 0))),
        compiler_params=pltpu.CompilerParams(
            dimension_semantics=("parallel", "parallel")),
    )(logits_pad, onehot, bboxes_pad, tgt_bbox_t)


def _full_spec(shape):
    return pl.BlockSpec(shape, lambda i: (0,) * len(shape))


def pallas_detr_loss(lse, picked, w, out_boxes, tgt_boxes, mask, coefs):
    # Single grid point is fine here: all inputs are O(N)+O(M) vectors (the
    # per-class logits never enter this kernel), so VMEM use is tiny even at
    # real DETR sizes and pipelining would only add per-step overhead.
    kernel = functools.partial(_loss_kernel, coef_class=coefs[0],
                               coef_bbox=coefs[1], coef_giou=coefs[2])
    return pl.pallas_call(
        kernel,
        out_shape=jax.ShapeDtypeStruct((1, 1), jnp.float32),
        grid=(1,),
        in_specs=[_full_spec(lse.shape), _full_spec(picked.shape),
                  _full_spec(w.shape), _full_spec(out_boxes.shape),
                  _full_spec(tgt_boxes.shape), _full_spec(mask.shape)],
        out_specs=_full_spec((1, 1)),
        compiler_params=pltpu.CompilerParams(
            dimension_semantics=("arbitrary",)),
    )(lse, picked, w, out_boxes, tgt_boxes, mask)


# ------------------------------- host glue -----------------------------------

def _hungarian_min_cost(cost):
    # O(n^2 * m) Hungarian (Jonker-Volgenant style potentials), n <= m.
    # Returns, for each row i, its assigned column.
    cost = np.asarray(cost, np.float64)
    n, m = cost.shape
    INF = float("inf")
    u = np.zeros(n + 1)
    v = np.zeros(m + 1)
    p = np.zeros(m + 1, dtype=np.int64)
    way = np.zeros(m + 1, dtype=np.int64)
    for i in range(1, n + 1):
        p[0] = i
        j0 = 0
        minv = np.full(m + 1, INF)
        used = np.zeros(m + 1, dtype=bool)
        while True:
            used[j0] = True
            i0 = p[j0]
            delta = INF
            j1 = 0
            for j in range(1, m + 1):
                if not used[j]:
                    cur = cost[i0 - 1, j - 1] - u[i0] - v[j]
                    if cur < minv[j]:
                        minv[j] = cur
                        way[j] = j0
                    if minv[j] < delta:
                        delta = minv[j]
                        j1 = j
            for j in range(m + 1):
                if used[j]:
                    u[p[j]] += delta
                    v[j] -= delta
                else:
                    minv[j] -= delta
            j0 = j1
            if p[j0] == 0:
                break
        while True:
            j1 = way[j0]
            p[j0] = p[j1]
            j0 = j1
            if j0 == 0:
                break
    row_to_col = np.zeros(n, dtype=np.int64)
    for j in range(1, m + 1):
        if p[j] != 0:
            row_to_col[p[j] - 1] = j - 1
    return row_to_col


def _linear_sum_assignment(cost):
    # scipy-like LSA for a (Q, n) cost matrix (sequential, host side).
    cost = np.asarray(cost, np.float64)
    q, n = cost.shape
    if n == 0:
        return np.zeros((0,), np.int64), np.zeros((0,), np.int64)
    if n <= q:
        col_to_row = _hungarian_min_cost(cost.T)   # per target -> query row
        rows, cols = col_to_row, np.arange(n, dtype=np.int64)
    else:
        row_to_col = _hungarian_min_cost(cost)
        rows, cols = np.arange(q, dtype=np.int64), row_to_col
    order = np.argsort(rows)
    return rows[order], cols[order]


class DETRLossPallas:
    def __init__(self, coef_class=1.0, coef_bbox=5.0, coef_giou=2.0,
                 num_classes=1, eos_coef=0.1):
        self.coef_class = float(coef_class)
        self.coef_bbox = float(coef_bbox)
        self.coef_giou = float(coef_giou)
        self.num_classes = num_classes
        self.temperature = 0.1
        ew = np.ones((num_classes + 1,), np.float32)
        ew[-1] = eos_coef
        self._empty_weight = jnp.asarray(ew)
        self._coefs = (self.coef_class, self.coef_bbox, self.coef_giou)
        # one jit per phase: device-side padding / one-hot / gathers fuse with
        # the pallas_call (no per-op dispatch, no dense H2D tensors).
        self._cost_phase = jax.jit(self._cost_phase_impl)
        self._loss_phase = jax.jit(self._loss_phase_impl)

    # ---------------- jitted device phases ----------------

    def _cost_phase_impl(self, logits, bboxes, tgt_ids, tgt_valid, tgt_bboxes):
        # logits: (B, Q, C), bboxes: (B, Q, 4), tgt_ids/tgt_valid: (B, T_pad),
        # tgt_bboxes: (B, T_pad, 4).  All pad / one-hot work happens on device.
        b, q, c = logits.shape
        c_pad = _round_up(c, 128)
        tile_q = min(512, _round_up(q, 8))       # fill MXU / DMA windows at real Q
        q_pad = _round_up(q, tile_q)
        logits_pad = jnp.pad(logits.astype(jnp.float32),
                             ((0, 0), (0, q_pad - q), (0, c_pad - c)),
                             constant_values=_NEG)
        bboxes_pad = jnp.pad(bboxes.astype(jnp.float32),
                             ((0, 0), (0, q_pad - q), (0, 0)))
        onehot = (jax.nn.one_hot(tgt_ids, c_pad, dtype=jnp.float32)
                  * tgt_valid[..., None])                     # (B, T_pad, C_pad)
        onehot = jnp.swapaxes(onehot, 1, 2)                   # (B, C_pad, T_pad)
        tgt_bbox_t = jnp.swapaxes(tgt_bboxes.astype(jnp.float32), 1, 2)
        return pallas_cost_matrix(logits_pad, onehot, bboxes_pad, tgt_bbox_t,
                                  self._coefs, tile_q)

    def _loss_phase_impl(self, logits, bboxes, lse_pad, tgt_labels,
                         out_box_idx, tgt_boxes_m, box_mask):
        # Class term only needs O(N) vectors: lse (reused from the cost kernel),
        # the picked logit (tiny gather) and the per-row class weight.
        b, q, c = logits.shape
        n = b * q
        n_pad = _round_up(n, 8)
        lse = lse_pad[:, :q, :].reshape(n, 1)
        labels = tgt_labels.reshape(n)
        picked = jnp.take_along_axis(logits.reshape(n, c).astype(jnp.float32),
                                     labels[:, None], axis=1)        # (N, 1)
        w = self._empty_weight[labels][:, None]                      # (N, 1)
        pad = n_pad - n
        lse = jnp.pad(lse, ((0, pad), (0, 0)))
        picked = jnp.pad(picked, ((0, pad), (0, 0)))
        w = jnp.pad(w, ((0, pad), (0, 0)))
        out_boxes_m = jnp.take(bboxes.reshape(n, 4).astype(jnp.float32),
                               out_box_idx, axis=0)                  # (M_pad, 4)
        loss = pallas_detr_loss(lse, picked, w, out_boxes_m,
                                tgt_boxes_m, box_mask, self._coefs)
        return loss[0, 0]

    # ---------------- forward ----------------

    def __call__(self, outputs, targets):
        B = len(outputs)
        Q, C = outputs[0]['logits'].shape

        # _align: drop invalid labels; fallback mirrors the reference.
        aligned = []
        for out, tar in zip(outputs, targets):
            labels = np.asarray(tar['labels'])
            bboxes = np.asarray(tar['bboxes'], np.float32)
            keep = labels < self.num_classes
            labels = labels[keep]
            bboxes = bboxes[keep]
            if len(labels) == 0:
                # TODO(synk): rarely-taken data-dependent random fallback from the
                # reference; stays on host.
                idn = random.randint(0, 32)
                labels = np.array([1], np.int64)
                bboxes = np.asarray(out['bboxes'], np.float32)[None, idn]
            aligned.append({'labels': labels.astype(np.int64), 'bboxes': bboxes})

        sizes = [len(t['labels']) for t in aligned]
        t_pad = _round_up(max(max(sizes), 1), 128)

        # small per-image int / f32 host tensors (no dense one-hot over PCIe)
        tgt_ids = np.zeros((B, t_pad), np.int32)
        tgt_valid = np.zeros((B, t_pad), np.float32)
        tgt_bboxes = np.zeros((B, t_pad, 4), np.float32)
        for b, t in enumerate(aligned):
            nb = sizes[b]
            tgt_ids[b, :nb] = t['labels']
            tgt_valid[b, :nb] = 1.0
            tgt_bboxes[b, :nb] = t['bboxes']

        logits = jnp.stack([jnp.asarray(o['logits'], jnp.float32) for o in outputs])
        bboxes = jnp.stack([jnp.asarray(o['bboxes'], jnp.float32) for o in outputs])

        # -------- phase 1: per-image (block-diagonal) cost + row lse on TPU ------
        cost_pad, lse_pad = self._cost_phase(
            logits, bboxes, jnp.asarray(tgt_ids), jnp.asarray(tgt_valid),
            jnp.asarray(tgt_bboxes))
        cost_np = np.asarray(cost_pad)   # single D2H sync, needed for the matcher

        indices = []
        for b in range(B):
            indices.append(_linear_sum_assignment(cost_np[b, :Q, :sizes[b]]))

        # -------- host gathers of matched pairs / classification targets --------
        batch_idx = np.concatenate(
            [np.full((len(ci),), b, np.int64) for b, (_, ci) in enumerate(indices)])
        out_idx = np.concatenate([np.asarray(ri, np.int64) for ri, _ in indices])
        matched_labels = np.concatenate(
            [t['labels'][np.asarray(ci)] for t, (_, ci) in zip(aligned, indices)])
        tgt_labels = np.full((B, Q), self.num_classes, np.int64)
        tgt_labels[batch_idx, out_idx] = matched_labels

        M = int(out_idx.shape[0])
        m_pad = _round_up(max(M, 1), 8)
        global_out_idx = np.zeros((m_pad,), np.int32)
        global_out_idx[:M] = batch_idx * Q + out_idx
        tgt_boxes_m = np.zeros((m_pad, 4), np.float32)
        tgt_boxes_m[:M] = np.concatenate(
            [t['bboxes'][np.asarray(ci)] for t, (_, ci) in zip(aligned, indices)])
        box_mask = np.zeros((m_pad, 1), np.float32)
        box_mask[:M] = 1.0

        # -------- phase 2: loss reduction on TPU --------
        return self._loss_phase(
            logits, bboxes, lse_pad, jnp.asarray(tgt_labels.astype(np.int32)),
            jnp.asarray(global_out_idx), jnp.asarray(tgt_boxes_m),
            jnp.asarray(box_mask))


# ---------------------------------- demo -------------------------------------

if __name__ == "__main__":
    random.seed(0)
    B, Q, num_classes = 2, 8, 1
    C = num_classes + 1

    key = jax.random.PRNGKey(0)
    keys = jax.random.split(key, 3 * B)
    outputs = []
    for b in range(B):
        logits = jax.random.normal(keys[2 * b], (Q, C), jnp.float32)
        bb = jax.random.uniform(keys[2 * b + 1], (Q, 4), jnp.float32, 0.1, 0.8)
        outputs.append({'logits': logits, 'bboxes': bb})

    n_tgt = [2, 3]
    targets = []
    for b in range(B):
        labels = jnp.zeros((n_tgt[b],), jnp.int32)   # all valid (< num_classes)
        bb = jax.random.uniform(keys[2 * B + b], (n_tgt[b], 4), jnp.float32, 0.1, 0.8)
        targets.append({'labels': labels, 'bboxes': bb})

    loss_fn = DETRLossPallas()
    loss = loss_fn(outputs, targets)
    jax.block_until_ready(loss)
    print("KERNEL_OK")
</pallas_src>

<mosaic_0001>
module attributes {stable_mosaic.version = 11 : i64} {
  func.func @_cost_kernel(%arg0: i32, %arg1: i32, %arg2: memref<1x8x128xf32, #tpu.memory_space<vmem>>, %arg3: memref<1x128x128xf32, #tpu.memory_space<vmem>>, %arg4: memref<1x8x4xf32, #tpu.memory_space<vmem>>, %arg5: memref<1x4x128xf32, #tpu.memory_space<vmem>>, %arg6: memref<1x8x128xf32, #tpu.memory_space<vmem>>, %arg7: memref<1x8x1xf32, #tpu.memory_space<vmem>>) attributes {dimension_semantics = [#tpu.dimension_semantics<parallel>, #tpu.dimension_semantics<parallel>], iteration_bounds = array<i64: 2, 1>, scalar_prefetch = 0 : i64, scratch_operands = 0 : i64, tpu.core_type = #tpu.core_type<tc>, window_params = [{transform_indices = @transform_0, window_bounds = array<i64: 1, 8, 128>}, {transform_indices = @transform_1, window_bounds = array<i64: 1, 128, 128>}, {transform_indices = @transform_2, window_bounds = array<i64: 1, 8, 4>}, {transform_indices = @transform_3, window_bounds = array<i64: 1, 4, 128>}, {transform_indices = @transform_4, window_bounds = array<i64: 1, 8, 128>}, {transform_indices = @transform_5, window_bounds = array<i64: 1, 8, 1>}]} {
    %c0 = arith.constant 0 : index
    %c0_0 = arith.constant 0 : index
    %c0_1 = arith.constant 0 : index
    %0 = vector.load %arg2[%c0, %c0_0, %c0_1] : memref<1x8x128xf32, #tpu.memory_space<vmem>>, vector<1x8x128xf32>
    %1 = vector.shape_cast %0 : vector<1x8x128xf32> to vector<8x128xf32>
    %c0_2 = arith.constant 0 : index
    %c0_3 = arith.constant 0 : index
    %c0_4 = arith.constant 0 : index
    %2 = vector.load %arg3[%c0_2, %c0_3, %c0_4] : memref<1x128x128xf32, #tpu.memory_space<vmem>>, vector<1x128x128xf32>
    %3 = vector.shape_cast %2 : vector<1x128x128xf32> to vector<128x128xf32>
    %c0_5 = arith.constant 0 : index
    %c0_6 = arith.constant 0 : index
    %c0_7 = arith.constant 0 : index
    %4 = vector.load %arg4[%c0_5, %c0_6, %c0_7] : memref<1x8x4xf32, #tpu.memory_space<vmem>>, vector<1x8x4xf32>
    %5 = vector.shape_cast %4 : vector<1x8x4xf32> to vector<8x4xf32>
    %c0_8 = arith.constant 0 : index
    %c0_9 = arith.constant 0 : index
    %c0_10 = arith.constant 0 : index
    %6 = vector.load %arg5[%c0_8, %c0_9, %c0_10] : memref<1x4x128xf32, #tpu.memory_space<vmem>>, vector<1x4x128xf32>
    %7 = vector.shape_cast %6 : vector<1x4x128xf32> to vector<4x128xf32>
    %cst = arith.constant dense<0xFF800000> : vector<8xf32>
    %8 = vector.multi_reduction <maximumf>, %1, %cst [1] : vector<8x128xf32> to vector<8xf32>
    %9 = vector.shape_cast %8 : vector<8xf32> to vector<8x1xf32>
    %10 = vector.broadcast %9 : vector<8x1xf32> to vector<8x128xf32>
    %11 = arith.subf %1, %10 : vector<8x128xf32>
    %12 = math.exp %11 : vector<8x128xf32>
    %cst_11 = arith.constant dense<0.000000e+00> : vector<8xf32>
    %13 = vector.multi_reduction <add>, %12, %cst_11 [1] : vector<8x128xf32> to vector<8xf32>
    %14 = vector.shape_cast %13 : vector<8xf32> to vector<8x1xf32>
    %15 = math.log %14 : vector<8x1xf32>
    %16 = arith.addf %9, %15 : vector<8x1xf32>
    %c0_12 = arith.constant 0 : index
    %c0_13 = arith.constant 0 : index
    %c0_14 = arith.constant 0 : index
    %17 = vector.load %arg7[%c0_12, %c0_13, %c0_14] : memref<1x8x1xf32, #tpu.memory_space<vmem>>, vector<1x8x1xf32>
    %18 = vector.shape_cast %17 : vector<1x8x1xf32> to vector<8x1xf32>
    %19 = vector.shape_cast %16 : vector<8x1xf32> to vector<1x8x1xf32>
    tpu.vector_store %arg7[%c0_12, %c0_13, %c0_14], %19 {strides = array<i32>} : memref<1x8x1xf32, #tpu.memory_space<vmem>>, vector<1x8x1xf32>,
    %cst_15 = arith.constant dense<0.000000e+00> : vector<8x128xf32>
    %20 = tpu.matmul %12, %3, %cst_15 {dimension_numbers = #tpu.dot_dimension_numbers<[1], [0], [0], [1], [0, 0, 1, 1], [], []>} : vector<8x128xf32>, vector<128x128xf32>, vector<8x128xf32> -> vector<8x128xf32>
    %21 = tpu.reciprocal %14 {approx = true} : vector<8x1xf32> -> vector<8x1xf32>
    %22 = vector.broadcast %21 : vector<8x1xf32> to vector<8x128xf32>
    %23 = arith.mulf %20, %22 : vector<8x128xf32>
    %cst_16 = arith.constant -1.000000e+00 : f32
    %24 = vector.broadcast %cst_16 : f32 to vector<8x128xf32>
    %25 = arith.mulf %24, %23 : vector<8x128xf32>
    %26 = vector.extract_strided_slice %5 {offsets = [0, 0], sizes = [8, 1], strides = [1, 1]} : vector<8x4xf32> to vector<8x1xf32>
    %27 = vector.extract_strided_slice %7 {offsets = [0, 0], sizes = [1, 128], strides = [1, 1]} : vector<4x128xf32> to vector<1x128xf32>
    %28 = vector.broadcast %26 : vector<8x1xf32> to vector<8x128xf32>
    %29 = vector.broadcast %27 : vector<1x128xf32> to vector<8x128xf32>
    %30 = arith.subf %28, %29 : vector<8x128xf32>
    %31 = math.absf %30 : vector<8x128xf32>
    %cst_17 = arith.constant 5.000000e+00 : f32
    %32 = vector.broadcast %cst_17 : f32 to vector<8x128xf32>
    %33 = arith.mulf %32, %31 : vector<8x128xf32>
    %34 = arith.addf %25, %33 : vector<8x128xf32>
    %35 = vector.extract_strided_slice %5 {offsets = [0, 1], sizes = [8, 1], strides = [1, 1]} : vector<8x4xf32> to vector<8x1xf32>
    %36 = vector.extract_strided_slice %7 {offsets = [1, 0], sizes = [1, 128], strides = [1, 1]} : vector<4x128xf32> to vector<1x128xf32>
    %37 = vector.broadcast %35 : vector<8x1xf32> to vector<8x128xf32>
    %38 = vector.broadcast %36 : vector<1x128xf32> to vector<8x128xf32>
    %39 = arith.subf %37, %38 : vector<8x128xf32>
    %40 = math.absf %39 : vector<8x128xf32>
    %cst_18 = arith.constant 5.000000e+00 : f32
    %41 = vector.broadcast %cst_18 : f32 to vector<8x128xf32>
    %42 = arith.mulf %41, %40 : vector<8x128xf32>
    %43 = arith.addf %34, %42 : vector<8x128xf32>
    %44 = vector.extract_strided_slice %5 {offsets = [0, 2], sizes = [8, 1], strides = [1, 1]} : vector<8x4xf32> to vector<8x1xf32>
    %45 = vector.extract_strided_slice %7 {offsets = [2, 0], sizes = [1, 128], strides = [1, 1]} : vector<4x128xf32> to vector<1x128xf32>
    %46 = vector.broadcast %44 : vector<8x1xf32> to vector<8x128xf32>
    %47 = vector.broadcast %45 : vector<1x128xf32> to vector<8x128xf32>
    %48 = arith.subf %46, %47 : vector<8x128xf32>
    %49 = math.absf %48 : vector<8x128xf32>
    %cst_19 = arith.constant 5.000000e+00 : f32
    %50 = vector.broadcast %cst_19 : f32 to vector<8x128xf32>
    %51 = arith.mulf %50, %49 : vector<8x128xf32>
    %52 = arith.addf %43, %51 : vector<8x128xf32>
    %53 = vector.extract_strided_slice %5 {offsets = [0, 3], sizes = [8, 1], strides = [1, 1]} : vector<8x4xf32> to vector<8x1xf32>
    %54 = vector.extract_strided_slice %7 {offsets = [3, 0], sizes = [1, 128], strides = [1, 1]} : vector<4x128xf32> to vector<1x128xf32>
    %55 = vector.broadcast %53 : vector<8x1xf32> to vector<8x128xf32>
    %56 = vector.broadcast %54 : vector<1x128xf32> to vector<8x128xf32>
    %57 = arith.subf %55, %56 : vector<8x128xf32>
    %58 = math.absf %57 : vector<8x128xf32>
    %cst_20 = arith.constant 5.000000e+00 : f32
    %59 = vector.broadcast %cst_20 : f32 to vector<8x128xf32>
    %60 = arith.mulf %59, %58 : vector<8x128xf32>
    %61 = arith.addf %52, %60 : vector<8x128xf32>
    %62 = vector.extract_strided_slice %5 {offsets = [0, 0], sizes = [8, 1], strides = [1, 1]} : vector<8x4xf32> to vector<8x1xf32>
    %63 = vector.extract_strided_slice %5 {offsets = [0, 1], sizes = [8, 1], strides = [1, 1]} : vector<8x4xf32> to vector<8x1xf32>
    %64 = vector.extract_strided_slice %5 {offsets = [0, 2], sizes = [8, 1], strides = [1, 1]} : vector<8x4xf32> to vector<8x1xf32>
    %65 = arith.addf %62, %64 : vector<8x1xf32>
    %66 = vector.extract_strided_slice %5 {offsets = [0, 3], sizes = [8, 1], strides = [1, 1]} : vector<8x4xf32> to vector<8x1xf32>
    %67 = arith.addf %63, %66 : vector<8x1xf32>
    %68 = vector.extract_strided_slice %7 {offsets = [0, 0], sizes = [1, 128], strides = [1, 1]} : vector<4x128xf32> to vector<1x128xf32>
    %69 = vector.extract_strided_slice %7 {offsets = [1, 0], sizes = [1, 128], strides = [1, 1]} : vector<4x128xf32> to vector<1x128xf32>
    %70 = vector.extract_strided_slice %7 {offsets = [2, 0], sizes = [1, 128], strides = [1, 1]} : vector<4x128xf32> to vector<1x128xf32>
    %71 = arith.addf %68, %70 : vector<1x128xf32>
    %72 = vector.extract_strided_slice %7 {offsets = [3, 0], sizes = [1, 128], strides = [1, 1]} : vector<4x128xf32> to vector<1x128xf32>
    %73 = arith.addf %69, %72 : vector<1x128xf32>
    %74 = arith.subf %65, %62 : vector<8x1xf32>
    %75 = arith.subf %67, %63 : vector<8x1xf32>
    %76 = arith.mulf %74, %75 : vector<8x1xf32>
    %77 = arith.subf %71, %68 : vector<1x128xf32>
    %78 = arith.subf %73, %69 : vector<1x128xf32>
    %79 = arith.mulf %77, %78 : vector<1x128xf32>
    %80 = vector.broadcast %65 : vector<8x1xf32> to vector<8x128xf32>
    %81 = vector.broadcast %71 : vector<1x128xf32> to vector<8x128xf32>
    %82 = arith.minimumf %80, %81 : vector<8x128xf32>
    %83 = vector.broadcast %62 : vector<8x1xf32> to vector<8x128xf32>
    %84 = vector.broadcast %68 : vector<1x128xf32> to vector<8x128xf32>
    %85 = arith.maximumf %83, %84 : vector<8x128xf32>
    %86 = arith.subf %82, %85 : vector<8x128xf32>
    %cst_21 = arith.constant 0.000000e+00 : f32
    %87 = vector.broadcast %cst_21 : f32 to vector<8x128xf32>
    %88 = arith.maximumf %86, %87 : vector<8x128xf32>
    %89 = vector.broadcast %67 : vector<8x1xf32> to vector<8x128xf32>
    %90 = vector.broadcast %73 : vector<1x128xf32> to vector<8x128xf32>
    %91 = arith.minimumf %89, %90 : vector<8x128xf32>
    %92 = vector.broadcast %63 : vector<8x1xf32> to vector<8x128xf32>
    %93 = vector.broadcast %69 : vector<1x128xf32> to vector<8x128xf32>
    %94 = arith.maximumf %92, %93 : vector<8x128xf32>
    %95 = arith.subf %91, %94 : vector<8x128xf32>
    %cst_22 = arith.constant 0.000000e+00 : f32
    %96 = vector.broadcast %cst_22 : f32 to vector<8x128xf32>
    %97 = arith.maximumf %95, %96 : vector<8x128xf32>
    %98 = arith.mulf %88, %97 : vector<8x128xf32>
    %99 = vector.broadcast %76 : vector<8x1xf32> to vector<8x128xf32>
    %100 = vector.broadcast %79 : vector<1x128xf32> to vector<8x128xf32>
    %101 = arith.addf %99, %100 : vector<8x128xf32>
    %102 = arith.subf %101, %98 : vector<8x128xf32>
    %cst_23 = arith.constant 9.99999993E-9 : f32
    %103 = vector.broadcast %cst_23 : f32 to vector<8x128xf32>
    %104 = arith.addf %102, %103 : vector<8x128xf32>
    %105 = tpu.reciprocal %104 {approx = true} : vector<8x128xf32> -> vector<8x128xf32>
    %106 = arith.mulf %98, %105 : vector<8x128xf32>
    %107 = vector.broadcast %65 : vector<8x1xf32> to vector<8x128xf32>
    %108 = vector.broadcast %71 : vector<1x128xf32> to vector<8x128xf32>
    %109 = arith.maximumf %107, %108 : vector<8x128xf32>
    %110 = vector.broadcast %62 : vector<8x1xf32> to vector<8x128xf32>
    %111 = vector.broadcast %68 : vector<1x128xf32> to vector<8x128xf32>
    %112 = arith.minimumf %110, %111 : vector<8x128xf32>
    %113 = arith.subf %109, %112 : vector<8x128xf32>
    %cst_24 = arith.constant 0.000000e+00 : f32
    %114 = vector.broadcast %cst_24 : f32 to vector<8x128xf32>
    %115 = arith.maximumf %113, %114 : vector<8x128xf32>
    %116 = vector.broadcast %67 : vector<8x1xf32> to vector<8x128xf32>
    %117 = vector.broadcast %73 : vector<1x128xf32> to vector<8x128xf32>
    %118 = arith.maximumf %116, %117 : vector<8x128xf32>
    %119 = vector.broadcast %63 : vector<8x1xf32> to vector<8x128xf32>
    %120 = vector.broadcast %69 : vector<1x128xf32> to vector<8x128xf32>
    %121 = arith.minimumf %119, %120 : vector<8x128xf32>
    %122 = arith.subf %118, %121 : vector<8x128xf32>
    %cst_25 = arith.constant 0.000000e+00 : f32
    %123 = vector.broadcast %cst_25 : f32 to vector<8x128xf32>
    %124 = arith.maximumf %122, %123 : vector<8x128xf32>
    %125 = arith.mulf %115, %124 : vector<8x128xf32>
    %126 = arith.subf %125, %102 : vector<8x128xf32>
    %cst_26 = arith.constant 9.99999993E-9 : f32
    %127 = vector.broadcast %cst_26 : f32 to vector<8x128xf32>
    %128 = arith.addf %125, %127 : vector<8x128xf32>
    %129 = tpu.reciprocal %128 {approx = true} : vector<8x128xf32> -> vector<8x128xf32>
    %130 = arith.mulf %126, %129 : vector<8x128xf32>
    %131 = arith.subf %106, %130 : vector<8x128xf32>
    %cst_27 = arith.constant 2.000000e+00 : f32
    %132 = vector.broadcast %cst_27 : f32 to vector<8x128xf32>
    %133 = arith.subf %132, %131 : vector<8x128xf32>
    %134 = arith.addf %61, %133 : vector<8x128xf32>
    %c0_28 = arith.constant 0 : index
    %c0_29 = arith.constant 0 : index
    %c0_30 = arith.constant 0 : index
    %135 = vector.load %arg6[%c0_28, %c0_29, %c0_30] : memref<1x8x128xf32, #tpu.memory_space<vmem>>, vector<1x8x128xf32>
    %136 = vector.shape_cast %135 : vector<1x8x128xf32> to vector<8x128xf32>
    %137 = vector.shape_cast %134 : vector<8x128xf32> to vector<1x8x128xf32>
    tpu.vector_store %arg6[%c0_28, %c0_29, %c0_30], %137 {strides = array<i32>} : memref<1x8x128xf32, #tpu.memory_space<vmem>>, vector<1x8x128xf32>,
    return
  }
  func.func @transform_0(%arg0: i32, %arg1: i32) -> (i32, i32, i32) {
    %c0_i32 = arith.constant 0 : i32
    %c0_i32_0 = arith.constant 0 : i32
    return %arg0, %arg1, %c0_i32 : i32, i32, i32
  }
  func.func @transform_1(%arg0: i32, %arg1: i32) -> (i32, i32, i32) {
    %c0_i32 = arith.constant 0 : i32
    %c0_i32_0 = arith.constant 0 : i32
    %c0_i32_1 = arith.constant 0 : i32
    return %arg0, %c0_i32, %c0_i32_0 : i32, i32, i32
  }
  func.func @transform_2(%arg0: i32, %arg1: i32) -> (i32, i32, i32) {
    %c0_i32 = arith.constant 0 : i32
    %c0_i32_0 = arith.constant 0 : i32
    return %arg0, %arg1, %c0_i32 : i32, i32, i32
  }
  func.func @transform_3(%arg0: i32, %arg1: i32) -> (i32, i32, i32) {
    %c0_i32 = arith.constant 0 : i32
    %c0_i32_0 = arith.constant 0 : i32
    %c0_i32_1 = arith.constant 0 : i32
    return %arg0, %c0_i32, %c0_i32_0 : i32, i32, i32
  }
  func.func @transform_4(%arg0: i32, %arg1: i32) -> (i32, i32, i32) {
    %c0_i32 = arith.constant 0 : i32
    %c0_i32_0 = arith.constant 0 : i32
    return %arg0, %arg1, %c0_i32 : i32, i32, i32
  }
  func.func @transform_5(%arg0: i32, %arg1: i32) -> (i32, i32, i32) {
    %c0_i32 = arith.constant 0 : i32
    %c0_i32_0 = arith.constant 0 : i32
    return %arg0, %arg1, %c0_i32 : i32, i32, i32
  }
}

</mosaic_0001>

<bundles_post_ra>
// kernel: _cost_phase_impl.1
= control target key start
LH: loop header
LB: loop body
LE: loop exit
PB: predicated region body
PF: predicated region fallthrough
CT: control target
= control target key end

     0   :  { %11 = vsyncpa [#allocation3], 0  ;;  %s1174_s0 = inlined_call_operand.vmem [shape: f32[2,8,128], index: 0, kind: input, shape index: {}]   ;;  %s1175_s1 = inlined_call_operand.vmem [shape: f32[2,128,128], index: 1, kind: input, shape index: {}]   ;;  %s1176_s2 = inlined_call_operand.vmem [shape: f32[2,8,4], index: 2, kind: input, shape index: {}]   ;;  %s1177_s3 = inlined_call_operand.vmem [shape: f32[2,4,128], index: 3, kind: input, shape index: {}]   ;;  %s1178_s4 = inlined_call_operand.hbm [shape: f32[2,8,128], index: 4, kind: output, shape index: {0}]   ;;  %s1179_s5 = inlined_call_operand.vmem [shape: f32[2,8,1], index: 5, kind: output, shape index: {1}]  }
   0x1   :  { %13 = vsyncpa [#allocation3 + $0x1], 0  ;;  %s1018_s18 = smov 0   ;;  %s1020_s19 = smov 0  }
   0x2   :  { %s1022_s20 = smov 0   ;;  %s1024_s21 = smov 0  }
   0x3   :  { %s1026_s22 = smov 0   ;;  %s1028_s23 = smov 0  }
   0x4 LB: > { %s724_s24 = sadd.s32 4294967295, %s976_s23   ;;  %s725_s25 = sadd.s32 4294967294, %s976_s23   ;;  %s976_s23 = sphi %s1028_s23, %s19_s23   ;;  %s972_s22 = sphi %s1026_s22, %s1186_s22   ;;  %s968_s21 = sphi %s1024_s21, %s1185_s21   ;;  %s964_s20 = sphi %s1022_s20, %s1184_s20   ;;  %s960_s19 = sphi %s1020_s19, %s1183_s19   ;;  %s956_s18 = sphi %s1018_s18, %s1182_s18  }
   0x5   : > { %s31_s26 = sadd.s32 1, %s972_s22  ;;  %s148_s27 = sadd.s32 1, %s964_s20 }
   0x6   : > { %p33_p0 = scmp.ge.s32.totalorder %s31_s26, 2  ;;  %p158_p1 = scmp.ne.s32.totalorder %s964_s20, %s960_s19 }
   0x7   : > { %p159_p2 = scmp.eq.s32.totalorder %s724_s24, 1  ;;  %p164_p3 = scmp.ne.s32.totalorder %s960_s19, %s956_s18 }
   0x8   : > { %s1188_s26 = smov (%p33_p0, %s31_s26), 0  ;;  %p165_p5 = scmp.eq.s32.totalorder %s725_s25, 1 }
   0x9   : > { %p1058_p4 = por %p159_p2, %p158_p1  ;;  %s143_s29 = ssub.s32 %s972_s22, %s1188_s26 }
   0xa   : > { %p728_p6 = scmp.ge.s32.totalorder %s976_s23, 1  ;;  %p146_p7 = scmp.eq.s32.totalorder %s143_s29, 0 }
   0xb   : > { %p1065_p8 = por %p165_p5, %p164_p3  ;;  %p246_p9 = scmp.lt.s32.totalorder %s976_s23, 3 }
   0xc   : > { %s1071_s6 = scalar_select %p146_p7, %s964_s20, %s148_s27  }
   0xd   : > { %p247_p10 = pnand %p728_p6, %p246_p9 }
   0xe   : > { %p299_p11 = scmp.lt.s32.totalorder (!%p247_p10), %s968_s21, 1  ;;  %v978_v0 = vmov (!%p247_p10), 0.0|0.0   ;;  %v979_v1 = vmov (!%p247_p10), 0   ;;  %s980_s25 = smov (!%p247_p10), 126   ;;  %vm981_vm0 = vmmov (!%p247_p10), 0   ;;  %v982_v28 = vmov (!%p247_p10), 0.0  }
   0xf   : > { %250 = sbr.rel (%p247_p10) target bundleno = 461 (0x1cd), region = 36  ;;  %793 = vmatprep.subr.bf16.mxu0 (!%p247_p10), %v978_v0  ;;  %881 = vset.pattern.permute.xlu0 (!%p247_p10), %v979_v1  ;;  %v983_v29 = vmov (!%p247_p10), 1   ;;  %s984_s27 = smov (!%p247_p10), 127   ;;  %v985_v37 = vmov (!%p247_p10), 3   ;;  %v986_v40 = vmov (!%p247_p10), 2   ;;  %vm358_vm1 = vcmask (!%p247_p10), 7168  }
  0x10   : > { %883 = vset.pattern.permute.xlu1 (!%p247_p10), %v979_v1  ;;  %790 = vmatprep.mubr.msk.f32.mxu0 (!%p247_p10), %vm981_vm0, %v982_v28  ;;  %v438_v46 = vlaneseq (!%p247_p10) }
  0x12   : > { %v439_v47 = vshrl.u32 (!%p247_p10), %v438_v46, 7 }
  0x14   : > { %v440_v48 = vsub.s32 (!%p247_p10), 0, %v439_v47  ;;  %v452_v50 = vsub.s32 (!%p247_p10), 1, %v439_v47 }
  0x16   : > { %s1076_s7 = scalar_select %p299_p11, %s968_s21, 1 }
  0x18   : > { %s1080_s8 = sshll.u32 %s1076_s7, 3  ;;  %s740_s9 = sshll.u32 %s1076_s7, 7 }
  0x19   : > { %s305_s12 = scalar_lea.vmem %s1174_s0, %s1080_s8  ;;  %s1090_s15 = scalar_lea.vmem %s1175_s1, %s740_s9 }
  0x1a   : > { %v329_v2 = vld [vmem:[%s305_s12] sm:$0xff]  ;;  %v331_v4 = vld [vmem:[%s1090_s15 + $0x8] sm:$0xff]  ;;  %v332_v6 = vld [vmem:[%s1090_s15 + $0x10] sm:$0xff]  ;;  %s317_s24 = scalar_lea.vmem %s1176_s2, %s1080_s8  ;;  %s328_s10 = scalar_lea.vmem %s1179_s5, %s1080_s8 }
  0x1b   : > { %v330_v3 = vld [vmem:[%s1090_s15] sm:$0xff]  ;;  %348 = vmax.xlane.f32.xlu0 %v329_v2  ;;  %v333_v7 = vld [vmem:[%s1090_s15 + $0x18] sm:$0xff]  ;;  %v335_v10 = vld [vmem:[%s1090_s15 + $0x28] sm:$0xff]  ;;  %s734_s11 = sshll.u32 %s1076_s7, 2  ;;  %s287_s7 = sand.u32 1, %s960_s19  }
  0x1c   : > { %v794_v5 = vpack.c.bf16 %v331_v4, %v330_v3  ;;  %v797_v8 = vpack.c.bf16 %v333_v7, %v332_v6  ;;  %v334_v9 = vld [vmem:[%s1090_s15 + $0x20] sm:$0xff]  ;;  %v336_v12 = vld [vmem:[%s1090_s15 + $0x30] sm:$0xff]  ;;  %v337_v13 = vld [vmem:[%s1090_s15 + $0x38] sm:$0xff]  ;;  %s321_s14 = scalar_lea.vmem %s1177_s3, %s734_s11  ;;  %s729_s8 = sshll.u32 %s287_s7, 3 }
  0x1d   : > { %v800_v11 = vpack.c.bf16 %v335_v10, %v334_v9  ;;  %v803_v14 = vpack.c.bf16 %v337_v13, %v336_v12  ;;  %v338_v15 = vld [vmem:[%s1090_s15 + $0x40] sm:$0xff]  ;;  %v339_v16 = vld [vmem:[%s1090_s15 + $0x48] sm:$0xff]  ;;  %v340_v18 = vld [vmem:[%s1090_s15 + $0x50] sm:$0xff]  ;;  %s289_s16 = scalar_lea.vmem [#allocation2], %s729_s8  ;;  %s559_s29 = scalar_lea.sflag [#allocation3], %s287_s7 }
  0x1e   : > { %795 = vmatpush3.bf16.msra.mxu0 %v794_v5  ;;  %v806_v17 = vpack.c.bf16 %v339_v16, %v338_v15  ;;  %v341_v19 = vld [vmem:[%s1090_s15 + $0x58] sm:$0xff]  ;;  %v346_v21 = vld [vmem:[%s317_s24] sm:$0xff]  ;;  %v343_v23 = vld [vmem:[%s1090_s15 + $0x68] sm:$0xff]  ;;  %s580_s17 = sshll.u32 %s289_s16, 4  ;;  %s1129_s17 = int_to_ptr.vmem [resolvable:$true] %s580_s17 }
  0x1f   : > { %796 = vmatprep.subr.bf16.mxu0 %v978_v0  ;;  %v809_v20 = vpack.c.bf16 %v341_v19, %v340_v18  ;;  %v342_v22 = vld [vmem:[%s1090_s15 + $0x60] sm:$0xff]  ;;  %v344_v25 = vld [vmem:[%s1090_s15 + $0x70] sm:$0xff]  ;;  %v345_v26 = vld [vmem:[%s1090_s15 + $0x78] sm:$0xff]  ;;  %s737_s15 = sshll.u32 %s968_s21, 7  ;;  %s898_s9 = scalar_lea.vmem %s1129_s17, 128 }
  0x20   : > { %v812_v24 = vpack.c.bf16 %v343_v23, %v342_v22  ;;  %v815_v27 = vpack.c.bf16 %v345_v26, %v344_v25  ;;  %v347_v51 = vld [vmem:[%s321_s14] sm:$0xf]  ;;  %p899_p12 = scmp.ne.s32.totalorder %s1129_s17, %s898_s9  ;;  %s987_s21 = smov [#allocation2]  }
  0x21   : > { %v441_v52 = vrot.slane %v347_v51, %v440_v48  ;;  %v453_v54 = vrot.slane %v347_v51, %v452_v50 }
  0x22   : > { %798 = vmatpush3.bf16.msra.mxu0 %v797_v8  ;;  %p900_p13 = pnand %p899_p12, %p1058_p4 }
  0x23   : > { %799 = vmatprep.subr.bf16.mxu0 %v978_v0 }
  0x24   : > { %p901_p0 = pneg %p900_p13 }
  0x26   : > { %801 = vmatpush3.bf16.msra.mxu0 %v800_v11 }
  0x27   : > { %802 = vmatprep.subr.bf16.mxu0 %v978_v0 }
  0x2a   : > { %804 = vmatpush3.bf16.msra.mxu0 %v803_v14 }
  0x2b   : > { %805 = vmatprep.subr.bf16.mxu0 %v978_v0 }
  0x2e   : > { %807 = vmatpush3.bf16.msra.mxu0 %v806_v17 }
  0x2f   : > { %808 = vmatprep.subr.bf16.mxu0 %v978_v0 }
  0x31   : > { %482 = vrot.lane.b32.xlu0 %v346_v21, %s980_s25 }
  0x32   : > { %810 = vmatpush3.bf16.msra.mxu0 %v809_v20 }
  0x33   : > { %811 = vmatprep.subr.bf16.mxu0 %v978_v0 }
  0x35   : > { %435 = vperm.xlu0 %881, %v346_v21  }
  0x36   : > { %813 = vmatpush3.bf16.msra.mxu0 %v812_v24  ;;  %v476_v24 = vsub.s32 3, %v439_v47 }
  0x37   : > { %814 = vmatprep.subr.bf16.mxu0 %v978_v0  ;;  %v487_v0 = vrot.slane %v347_v51, 2 }
  0x39   : > { %882 = vset.pattern.permute.xlu0 %v983_v29  ;;  %v489_v4 = vadd.f32 %v487_v0, %v347_v51 }
  0x3a   : > { %816 = vmatpush3.bf16.msra.mxu0 %v815_v27  ;;  %447 = vperm.xlu0 %882, %v346_v21  }
  0x3b   : > { %v509_v6 = vrot.slane %v489_v4, %v440_v48  ;;  %v521_v7 = vrot.slane %v489_v4, %v452_v50  ;;  %v496_v9 = vsub.f32 %v489_v4, %v347_v51 }
  0x3d   : > { %v498_v16 = vrot.slane %v496_v9, 1 }
  0x3f   : > { %v500_v22 = vmul.f32 %v498_v16, %v496_v9 }
  0x41   : > { %v535_v28 = vrot.slane %v500_v22, %v440_v48 }
  0xa8   : > { %v349_v30 = vpop.xlane.xlu0 %348 }
  0xa9   : > { %v350_v31 = vsub.f32 %v329_v2, %v349_v30 }
  0xab   : > { %v351_v32 = vmul.f32 1.442695, %v350_v31  ;;  %v477_v31 = vrot.slane %v347_v51, %v476_v24 }
  0xac   : > { %v483_v33 = vpop.permute.xlu0 %482 }
  0xad   : > { %888 = vpow2.f32 %v351_v32  ;;  %v485_v34 = vadd.f32 %v483_v33, %v346_v21 }
  0xaf   : > { %515 = vperm.xlu0 %882, %v485_v34   ;;  %v490_v35 = vsub.f32 %v485_v34, %v346_v21 }
  0xb1   : > { %492 = vrot.lane.b32.xlu1 %v490_v35, %s984_s27  ;;  %s1127_s27 = scalar_lea.hbm %s1178_s4, %s737_s15 }
  0xb3   : > { %884 = vset.pattern.permute.xlu0 %v979_v1 }
  0xb4   : > { %v436_v49 = vpop.permute.xlu0 %435 }
  0xb5   : > { %503 = vperm.xlu1 %883, %v485_v34   ;;  %v442_v53 = vsub.f32 %v436_v49, %v441_v52  ;;  %v542_v10 = vmin.f32 %v436_v49, %v441_v52  ;;  %v511_v14 = vmax.f32 %v436_v49, %v441_v52 }
  0xb7   : > { %v889_v36 = vpop.eup %888  ;;  %v443_v57 = vand.u32 2147483647, %v442_v53 }
  0xb8   : > { %791 = vmatmul.mubr.f32.vlgmr.msra.gmra.mrb[0].mxu0 %v889_v36 }
  0xb9   : > { %886 = vset.pattern.permute.xlu1 %v985_v37  ;;  %v448_v55 = vpop.permute.xlu0 %447  ;;  %v444_v61 = vmul.f32 5.0, %v443_v57 }
  0xba   : > { %v454_v56 = vsub.f32 %v448_v55, %v453_v54  ;;  %v546_v12 = vmin.f32 %v448_v55, %v453_v54  ;;  %v523_v18 = vmax.f32 %v448_v55, %v453_v54 }
  0xbc   : > { %v455_v58 = vand.u32 2147483647, %v454_v56 }
  0xd9   : > { %353 = vadd.xlane.f32.xlu1 %v889_v36 }
  0xea   : > { %471 = vperm.xlu1 %886, %v346_v21  }
 0x123   : > { %v493_v38 = vpop.permute.xlu1 %492 }
 0x124   : > { %v495_v39 = vmul.f32 %v493_v38, %v490_v35 }
 0x126   : > { %529 = vperm.xlu0 %884, %v495_v39  }
 0x12a   : > { %885 = vset.pattern.permute.xlu0 %v986_v40 }
 0x12b   : > { %459 = vperm.xlu0 %885, %v346_v21  }
 0x12e   : > { %v516_v8 = vpop.permute.xlu0 %515 }
 0x12f   : > { %887 = vset.pattern.permute.xlu0 %v979_v1  ;;  %v456_v1 = vmul.f32 5.0, %v455_v58  ;;  %v545_v13 = vmax.f32 %v516_v8, %v521_v7  ;;  %v522_v19 = vmin.f32 %v516_v8, %v521_v7 }
 0x131   : > { %v547_v20 = vsub.f32 %v545_v13, %v546_v12  ;;  %v524_v25 = vsub.f32 %v522_v19, %v523_v18 }
 0x133   : > { %v548_v26 = vmax.f32 %v547_v20, 0.0  ;;  %v525_v32 = vmax.f32 %v524_v25, 0.0 }
 0x134   : > { %v504_v41 = vpop.permute.xlu1 %503 }
 0x135   : > { %v541_v11 = vmax.f32 %v504_v41, %v509_v6  ;;  %v510_v15 = vmin.f32 %v504_v41, %v509_v6 }
 0x137   : > { %v543_v17 = vsub.f32 %v541_v11, %v542_v10  ;;  %v512_v21 = vsub.f32 %v510_v15, %v511_v14 }
 0x139   : > { %v544_v23 = vmax.f32 %v543_v17, 0.0  ;;  %v513_v27 = vmax.f32 %v512_v21, 0.0 }
 0x13b   : > { %v549_v29 = vmul.f32 %v548_v26, %v544_v23  ;;  %v526_v35 = vmul.f32 %v525_v32, %v513_v27 }
 0x13d   : > { %v551_v37 = vadd.f32 1e-08, %v549_v29 }
 0x166   : > { %v354_v42 = vpop.xlane.xlu1 %353 }
 0x167   : > { %890 = vlog2.f32 %v354_v42 }
 0x168   : > { %892 = vrcp.f32 %v354_v42 }
 0x169   : > { %894 = vrcp.f32 %v551_v37 }
 0x16a   : > { %v472_v33 = vpop.permute.xlu1 %471 }
 0x16b   : > { %v478_v39 = vsub.f32 %v472_v33, %v477_v31 }
 0x171   : > { %v891_v43 = vpop.eup %890 }
 0x172   : > { %v356_v44 = vmul.f32 0.6931472, %v891_v43  ;;  %v893_v59 = vpop.eup %892 }
 0x173   : > { %v895_v52 = vpop.eup %894 }
 0x174   : > { %v357_v45 = vadd.f32 %v356_v44, %v349_v30  ;;  %v464_v30 = vsub.s32 2, %v439_v47  ;;  %v479_v44 = vand.u32 2147483647, %v478_v39 }
 0x176   : > { %359 = vst.msk [vmem:[%s328_s10] sm:$0xff] %vm358_vm1, %v357_v45  ;;  %v465_v38 = vrot.slane %v347_v51, %v464_v30  ;;  %v480_v47 = vmul.f32 5.0, %v479_v44  ;;  %s902_s10 = sshll.u32 %s987_s21, 4  ;;  %s903_s10 = int_to_ptr.vmem [resolvable:$false] %s902_s10 }
 0x177   : > { %s904_s11 = scalar_lea.vmem %s903_s10, 256  ;;  %p905_p1 = scmp.lt.s32.totalorder %s1129_s17, %s903_s10 }
 0x178   : > { %p906_p2 = scmp.lt.s32.totalorder %s904_s11, %s898_s9 }
 0x17a   : > { %p907_p3 = por %p906_p2, %p905_p1 }
 0x17c   : > { %p908_p5 = pnand %p907_p3, %p901_p0 }
 0x18b   : > { %v426_v60 = vpop.f32.mrb[0].mxu0 }
 0x18c   : > { %v431_v62 = vmul.f32 %v893_v59, %v426_v60  ;;  %v792_v63 = vpop.f32.mrb[1].mxu0 }
 0x18e   : > { %v432_v2 = vmul.f32 -1.0, %v431_v62 }
 0x190   : > { %v445_v3 = vadd.f32 %v444_v61, %v432_v2 }
 0x192   : > { %v457_v5 = vadd.f32 %v456_v1, %v445_v3 }
 0x1a5   : > { %v530_v34 = vpop.permute.xlu0 %529 }
 0x1a6   : > { %v536_v36 = vadd.f32 %v535_v28, %v530_v34 }
 0x1a8   : > { %v537_v40 = vsub.f32 %v536_v36, %v526_v35 }
 0x1aa   : > { %v538_v41 = vadd.f32 1e-08, %v537_v40  ;;  %v460_v42 = vpop.permute.xlu0 %459  ;;  %v550_v49 = vsub.f32 %v549_v29, %v537_v40 }
 0x1ab   : > { %v466_v43 = vsub.f32 %v460_v42, %v465_v38 }
 0x1ac   : > { %896 = vrcp.f32 %v538_v41  ;;  %v553_v54 = vmul.f32 %v895_v52, %v550_v49 }
 0x1ad   : > { %v467_v45 = vand.u32 2147483647, %v466_v43 }
 0x1af   : > { %v468_v46 = vmul.f32 5.0, %v467_v45 }
 0x1b1   : > { %v469_v48 = vadd.f32 %v468_v46, %v457_v5 }
 0x1b3   : > { %v481_v50 = vadd.f32 %v480_v47, %v469_v48 }
 0x1b6   : > { %v897_v51 = vpop.eup %896 }
 0x1b7   : > { %v540_v53 = vmul.f32 %v897_v51, %v526_v35 }
 0x1b9   : > { %v554_v55 = vsub.f32 %v540_v53, %v553_v54 }
 0x1bb   : > { %v555_v56 = vsub.f32 2.0, %v554_v55 }
 0x1bd   : > { %v556_v57 = vadd.f32 %v555_v56, %v481_v50 }
 0x1bf   : > { %557 = vst [vmem:[%s289_s16] sm:$0xff] %v556_v57 }
 0x1c0   : > { %911 = shalt.err (!%p908_p5)
}
 0x1c1   : > { %s912_s12 = scalar_lea.hbm %s1127_s27, 128  ;;  %s916_s7 = scalar_lea.hbm %s1178_s4, 256 }
 0x1c2   : > { %p913_p6 = scmp.ne.s32.totalorder %s1127_s27, %s912_s12  ;;  %p917_p10 = scmp.lt.u32.totalorder %s1127_s27, %s1178_s4 }
 0x1c3   : > { %p918_p11 = scmp.lt.u32.totalorder %s916_s7, %s912_s12  ;;  %p920_p13 = scmp.lt.u32.totalorder %s912_s12, %s1127_s27 }
 0x1c4   : > { %p914_p7 = pnand %p913_p6, %p1058_p4 }
 0x1c5   : > { %p919_p12 = por %p918_p11, %p917_p10 }
 0x1c6   : > { %p915_p9 = pneg %p914_p7 }
 0x1c7   : > { %p921_p0 = por %p920_p13, %p919_p12 }
 0x1c9   : > { %p922_p1 = pnand %p921_p0, %p915_p9 }
 0x1cb   : > { %925 = shalt.err (!%p922_p1)
}
 0x1cc   : > { %817 = dma.vmem_to_hbm [thread:$0]  (%p1058_p4), %s1129_s17, 128, %s1127_s27, %s559_s29  }
 0x1cd PF: > { %p823_p2 = scmp.ge.s32.totalorder %s976_s23, 2  ;;  %s595_s16 = sand.u32 1, %s956_s18  }
 0x1ce   : > { %s596_s24 = scalar_lea.sflag [#allocation3], %s595_s16 }
 0x1cf   : > { %p820_p3 = pnand %p823_p2, %p1065_p8 }
 0x1d1   : > { %951 = dma.done.wait (!%p820_p3), %s596_s24, 128  }
 0x1d2   : > { %953 = vsyncadd (!%p820_p3), %s596_s24, 4294967168  ;;  %s19_s23 = sadd.s32 1, %s976_s23   ;;  %s1182_s18 = smov %s960_s19 }
 0x1d3   : > { %p16_p5 = scmp.ge.s32.totalorder %s19_s23, 4   ;;  %s1183_s19 = smov %s964_s20 }
 0x1d4   : > { %s1184_s20 = smov %s1071_s6  ;;  %s1185_s21 = smov %s972_s22 }
 0x1d5   : > { %s1186_s22 = smov %s1188_s26  ;;  %18 = sbr.rel (!%p16_p5) target bundleno = 4 (0x4), region = 92 }
 0x1dc   :  { %611 = vsyncpa [#allocation3], 1 }
 0x1dd   :  { %613 = vsyncpa [#allocation3 + $0x1], 1 }

</bundles_post_ra>
